<compile_context>
chip_gen: v7x
topology: tpu7x:2x2x1
jax: 0.10.0
libtpu: 0.0.40
codegen_flags: <defaults>
</compile_context>

<pallas_src>
import functools

import jax
import jax.numpy as jnp
from jax.experimental import pallas as pl
from jax.experimental.pallas import tpu as pltpu

_LANE = 128
_WIDTH_CANDIDATES = (4096, 2048, 1024, 512, 256, 128)   # lane-dense widths
_TARGET_BLOCK_BYTES = 2 * 1024 * 1024                    # ~2 MiB per buffer


def _sublane_multiple(itemsize: int) -> int:
    # f32 -> 8 sublanes/vreg, bf16/fp16 -> 16, int8/fp8 -> 32
    return {4: 8, 2: 16, 1: 32}.get(itemsize, 8)


def _poly_kernel(x_ref, o_ref, *, power: int):
    x = x_ref[...]
    # Accumulate in f32 for low-precision inputs (matches torch.pow accuracy).
    xc = x.astype(jnp.float32) if x.dtype != jnp.float32 else x

    p = abs(power)
    if p == 0:
        y = jnp.ones_like(xc)
    else:
        # Square-and-multiply: exact for integer powers, minimal VPU multiplies.
        y = None
        base = xc
        e = p
        while e > 0:
            if e & 1:
                y = base if y is None else y * base
            e >>= 1
            if e:
                base = base * base
    if power < 0:
        y = 1.0 / y

    o_ref[...] = y.astype(o_ref.dtype)


def polynomial_activation(x: jax.Array, power: int = 2) -> jax.Array:
    """Elementwise x ** power (integer power) via a Pallas TPU kernel."""
    if not isinstance(power, int):
        raise TypeError("power must be a Python int (PolynomialActivation(pow: int)).")

    orig_shape = x.shape
    dtype = x.dtype
    n = x.size
    if n == 0:
        return x

    itemsize = jnp.dtype(dtype).itemsize
    sub = _sublane_multiple(itemsize)

    flat = x.reshape(-1)

    # Pick the widest lane-dense width that divides n -> no pad / no output
    # slice (no extra HBM copies) in the aligned case.
    width = next((w for w in _WIDTH_CANDIDATES if n % w == 0), None)
    padded = False
    if width is None:
        width = 512
        padded_n = pl.cdiv(n, width) * width
        flat = jnp.pad(flat, (0, padded_n - n))
        padded = True
        total = padded_n
    else:
        total = n

    rows = total // width
    x2d = flat.reshape(rows, width)

    # ~2 MiB blocks: tile_r rows of `width` lanes, tile_r a multiple of the
    # dtype's sublane packing.  Small inputs get a single full-array block.
    target_rows = max(sub, ((_TARGET_BLOCK_BYTES // itemsize) // width) // sub * sub)
    tile_r = rows if rows <= target_rows else target_rows
    grid = (pl.cdiv(rows, tile_r),)   # ragged last block handled by Pallas

    # Advisory cost estimate for XLA scheduling.
    p_abs = abs(power)
    n_mults = (p_abs.bit_length() - 1) + bin(p_abs).count("1") - 1 if p_abs else 0
    cost = pl.CostEstimate(
        flops=max(1, n_mults) * total,
        transcendentals=0,
        bytes_accessed=2 * total * itemsize,
    )

    out2d = pl.pallas_call(
        functools.partial(_poly_kernel, power=power),
        out_shape=jax.ShapeDtypeStruct((rows, width), dtype),
        grid_spec=pltpu.PrefetchScalarGridSpec(
            num_scalar_prefetch=0,
            grid=grid,
            in_specs=[pl.BlockSpec((tile_r, width), lambda i: (i, 0))],
            out_specs=pl.BlockSpec((tile_r, width), lambda i: (i, 0)),
        ),
        compiler_params=pltpu.CompilerParams(dimension_semantics=("parallel",)),
        cost_estimate=cost,
    )(x2d)

    out_flat = out2d.reshape(-1)
    if padded:
        out_flat = out_flat[:n]
    return out_flat.reshape(orig_shape)


if __name__ == "__main__":
    key = jax.random.PRNGKey(0)
    # NCHW input, matching the torch module's expected use.
    x = jax.random.normal(key, (2, 4, 16, 16), dtype=jnp.float32)

    power = 2
    y = jax.block_until_ready(polynomial_activation(x, power=power))
    y_ref = x ** power
    assert y.shape == x.shape and y.dtype == x.dtype
    assert jnp.allclose(y, y_ref, atol=1e-6, rtol=1e-6), "mismatch vs reference (power=2)"

    # Extra check: odd power + unaligned element count (exercises pad fallback).
    x2 = jax.random.normal(jax.random.PRNGKey(1), (3, 5, 7), dtype=jnp.float32)
    y2 = jax.block_until_ready(polynomial_activation(x2, power=3))
    assert jnp.allclose(y2, x2 ** 3, atol=1e-5, rtol=1e-5), "mismatch vs reference (power=3)"

    print("KERNEL_OK")
</pallas_src>

<mosaic_0001>
module attributes {stable_mosaic.version = 11 : i64} {
  func.func @_poly_kernel(%arg0: i32, %arg1: memref<1x2048xf32, #tpu.memory_space<vmem>>, %arg2: memref<1x2048xf32, #tpu.memory_space<vmem>>) attributes {dimension_semantics = [#tpu.dimension_semantics<parallel>], iteration_bounds = array<i64: 1>, scalar_prefetch = 0 : i64, scratch_operands = 0 : i64, tpu.core_type = #tpu.core_type<tc>, window_params = [{transform_indices = @transform_0, window_bounds = array<i64: 1, 2048>}, {transform_indices = @transform_1, window_bounds = array<i64: 1, 2048>}]} {
    %c0 = arith.constant 0 : index
    %c0_0 = arith.constant 0 : index
    %0 = vector.load %arg1[%c0, %c0_0] : memref<1x2048xf32, #tpu.memory_space<vmem>>, vector<1x2048xf32>
    %1 = arith.mulf %0, %0 : vector<1x2048xf32>
    %c0_1 = arith.constant 0 : index
    %c0_2 = arith.constant 0 : index
    %2 = vector.load %arg2[%c0_1, %c0_2] : memref<1x2048xf32, #tpu.memory_space<vmem>>, vector<1x2048xf32>
    tpu.vector_store %arg2[%c0_1, %c0_2], %1 {strides = array<i32>} : memref<1x2048xf32, #tpu.memory_space<vmem>>, vector<1x2048xf32>,
    return
  }
  func.func @transform_0(%arg0: i32) -> (i32, i32) {
    %c0_i32 = arith.constant 0 : i32
    %c0_i32_0 = arith.constant 0 : i32
    return %arg0, %c0_i32 : i32, i32
  }
  func.func @transform_1(%arg0: i32) -> (i32, i32) {
    %c0_i32 = arith.constant 0 : i32
    %c0_i32_0 = arith.constant 0 : i32
    return %arg0, %c0_i32 : i32, i32
  }
}

</mosaic_0001>

<bundles_post_ra>
// kernel: tpu_custom_call.1
= control target key start
LH: loop header
LB: loop body
LE: loop exit
PB: predicated region body
PF: predicated region fallthrough
CT: control target
= control target key end

     0   :  { %6 = vsyncpa [#allocation3], 0  ;;  %s128_s0 = inlined_call_operand.hbm [shape: f32[1,2048], index: 0, kind: input, shape index: {}]   ;;  %s129_s1 = inlined_call_operand.hbm [shape: f32[1,2048], index: 1, kind: output, shape index: {}]  }
   0x1   :  { %7 = vsyncpa [#allocation4], 0  ;;  %s92_s6 = smov [#allocation2]   ;;  %s44_s10 = scalar_lea.hbm %s128_s0, 256 }
   0x2   :  { %s14_s7 = sshll.u32 %s92_s6, 4  ;;  %p45_p0 = scmp.ne.s32.totalorder %s128_s0, %s44_s10  ;;  %s15_s7 = int_to_ptr.vmem [resolvable:$true] %s14_s7 }
   0x3   :  { %p48_p1 = scmp.lt.u32.totalorder %s44_s10, %s128_s0 }
   0x5   :  { %p50_p2 = pnand %p48_p1, %p45_p0 }
   0x7   :  { %53 = shalt.err (!%p50_p2)
}
   0x8   :  { %s54_s15 = scalar_lea.vmem %s15_s7, 256  ;;  %p59_p4 = scmp.lt.s32.totalorder %s15_s7, %s15_s7 }
   0x9   :  { %p55_p3 = scmp.ne.s32.totalorder %s15_s7, %s54_s15  ;;  %p60_p5 = scmp.lt.s32.totalorder %s54_s15, %s54_s15 }
   0xb   :  { %p61_p6 = por %p60_p5, %p59_p4 }
   0xd   :  { %p62_p7 = pnand %p61_p6, %p55_p3 }
   0xf   :  { %65 = shalt.err (!%p62_p7)
}
  0x10   :  { %17 = dma.hbm_to_vmem [thread:$0]  %s128_s0, 256, %s15_s7, [#allocation3]  }
  0x11   :  { %88 = dma.done.wait [#allocation3], 256  }
  0x12   :  { %89 = vsyncadd [#allocation3], 4294967040  ;;  %s93_s18 = smov [#allocation5]   ;;  %v21_v0 = vld [vmem:[#allocation2] sm:$0xff]  ;;  %v22_v1 = vld [vmem:[#allocation2 + $0x8] sm:$0xff] }
  0x13   :  { %s33_s19 = sshll.u32 %s93_s18, 4  ;;  %v23_v2 = vmul.f32 %v21_v0, %v21_v0  ;;  %v24_v3 = vmul.f32 %v22_v1, %v22_v1  ;;  %s34_s19 = int_to_ptr.vmem [resolvable:$true] %s33_s19 }
  0x14   :  { %s66_s20 = scalar_lea.vmem %s34_s19, 256  ;;  %p71_p9 = scmp.lt.s32.totalorder %s34_s19, %s34_s19 }
  0x15   :  { %25 = vst [vmem:[#allocation5] sm:$0xff] %v23_v2  ;;  %26 = vst [vmem:[#allocation5 + $0x8] sm:$0xff] %v24_v3  ;;  %p67_p8 = scmp.ne.s32.totalorder %s34_s19, %s66_s20  ;;  %p72_p10 = scmp.lt.s32.totalorder %s66_s20, %s66_s20 }
  0x17   :  { %p73_p11 = por %p72_p10, %p71_p9 }
  0x19   :  { %p74_p12 = pnand %p73_p11, %p67_p8 }
  0x1b   :  { %77 = shalt.err (!%p74_p12)
}
  0x1c   :  { %s78_s22 = scalar_lea.hbm %s129_s1, 256 }
  0x1d   :  { %p79_p13 = scmp.ne.s32.totalorder %s129_s1, %s78_s22  ;;  %p82_p0 = scmp.lt.u32.totalorder %s78_s22, %s129_s1 }
  0x1f   :  { %p84_p1 = pnand %p82_p0, %p79_p13 }
  0x21   :  { %87 = shalt.err (!%p84_p1)
}
  0x22   :  { %36 = dma.vmem_to_hbm [thread:$0]  %s34_s19, 256, %s129_s1, [#allocation4]  }
  0x23   :  { %90 = dma.done.wait [#allocation4], 256  }
  0x24   :  { %91 = vsyncadd [#allocation4], 4294967040 }
  0x25   :  { %40 = vsyncpa [#allocation3], 1 }
  0x26   :  { %41 = vsyncpa [#allocation4], 1 }

</bundles_post_ra>
